<compile_context>
chip_gen: v7x
topology: tpu7x:2x2x1
jax: 0.10.0
libtpu: 0.0.40
codegen_flags: <defaults>
</compile_context>

<pallas_src>
import jax
import jax.numpy as jnp
from jax import lax
from jax.experimental import pallas as pl
from jax.experimental.pallas import tpu as pltpu


def _mlp_kernel(x_ref, w1_ref, b1_ref, w2_ref, b2_ref, o_ref):
    # x_ref : (TILE_B, D) f32      w1_ref: (H, D) f32
    # b1_ref: (H, 1) f32           w2_ref: (H, 1) f32      b2_ref: (1, 1) f32
    # o_ref : (1, TILE_B) f32      (batch along lanes -> lane-dense stores)
    # linear1: contract the D axis of both operands -> (H, TILE_B) on the MXU.
    h = lax.dot_general(
        w1_ref[...], x_ref[...],
        dimension_numbers=(((1,), (1,)), ((), ())),
        preferred_element_type=jnp.float32)
    h = jnp.maximum(h + b1_ref[...], 0.0)                    # bias + ReLU (VPU, f32)
    # linear2 (out_features == 1): VPU multiply + sublane reduce (XLU) instead of
    # a degenerate N=1 MXU matmul; keeps the output lane-dense.
    out = jnp.sum(h * w2_ref[...], axis=0, keepdims=True)    # (1, TILE_B)
    o_ref[...] = jax.nn.sigmoid(out + b2_ref[...]).astype(o_ref.dtype)


def neural_net1_forward(x, w1, b1, w2, b2, *, tile_b=None):
    """Forward pass of NeuralNet1 (PyTorch nn.Linear parameter layout).

    x : (B, D_in) f32   w1: (H, D_in)   b1: (H,)   w2: (1, H)   b2: (1,)
    returns (B, 1), same dtype as x.
    """
    B, D = x.shape
    H = w1.shape[0]

    if tile_b is None:
        tile_b = 16384  # 2 MiB f32 x tile; amortizes per-step grid overhead
    if B >= 128:
        # Lane-aligned tiles no larger than the batch; ragged last block is
        # handled by Pallas partial-block masking.
        tile_b = max(128, (min(tile_b, B) // 128) * 128)
    else:
        # Tiny batch: one block equal to the full array dims (no alignment
        # constraint applies in that case).
        tile_b = B
    grid = (pl.cdiv(B, tile_b),)

    # Tiny parameter reshapes only (64 / 1 elements); x streams untouched.
    w1_c = w1.astype(jnp.float32)                      # (H, D)
    b1_c = b1.reshape(H, 1).astype(jnp.float32)        # (H, 1)
    w2_c = jnp.transpose(w2).astype(jnp.float32)       # (H, 1)
    b2_c = b2.reshape(1, 1).astype(jnp.float32)        # (1, 1)

    out = pl.pallas_call(
        _mlp_kernel,
        out_shape=jax.ShapeDtypeStruct((1, B), jnp.float32),
        grid=grid,
        in_specs=[
            pl.BlockSpec((tile_b, D), lambda i: (i, 0)),   # x streams per step
            pl.BlockSpec((H, D), lambda i: (0, 0)),        # weights stay resident
            pl.BlockSpec((H, 1), lambda i: (0, 0)),
            pl.BlockSpec((H, 1), lambda i: (0, 0)),
            pl.BlockSpec((1, 1), lambda i: (0, 0)),
        ],
        out_specs=pl.BlockSpec((1, tile_b), lambda i: (0, i)),  # lane-dense output
        compiler_params=pltpu.CompilerParams(
            dimension_semantics=("parallel",)),                 # megacore on v7x
    )(x.astype(jnp.float32), w1_c, b1_c, w2_c, b2_c)

    return out.reshape(B, 1).astype(x.dtype)


def neural_net1_reference(x, w1, b1, w2, b2):
    h = jnp.maximum(x @ w1.T + b1, 0.0)
    return jax.nn.sigmoid(h @ w2.T + b2)


if __name__ == "__main__":
    key = jax.random.PRNGKey(0)
    D_in, H = 32, 64
    k_x, k_w1, k_b1, k_w2, k_b2 = jax.random.split(key, 5)

    # PyTorch Linear-style U(-1/sqrt(fan_in), 1/sqrt(fan_in)) init, PyTorch layout.
    lim1 = 1.0 / jnp.sqrt(jnp.float32(D_in))
    lim2 = 1.0 / jnp.sqrt(jnp.float32(H))
    w1 = jax.random.uniform(k_w1, (H, D_in), jnp.float32, -lim1, lim1)
    b1 = jax.random.uniform(k_b1, (H,), jnp.float32, -lim1, lim1)
    w2 = jax.random.uniform(k_w2, (1, H), jnp.float32, -lim2, lim2)
    b2 = jax.random.uniform(k_b2, (1,), jnp.float32, -lim2, lim2)

    # Small batch: single block equal to the full array dims.
    x_small = jax.random.normal(k_x, (8, D_in), dtype=jnp.float32)
    y = neural_net1_forward(x_small, w1, b1, w2, b2)
    jax.block_until_ready(y)
    y_ref = neural_net1_reference(x_small, w1, b1, w2, b2)
    assert y.shape == (8, 1)
    assert jnp.allclose(y, y_ref, atol=1e-3, rtol=1e-3), \
        float(jnp.max(jnp.abs(y - y_ref)))

    # Larger batch: multiple grid steps + ragged (masked) last block.
    x_big = jax.random.normal(k_x, (300, D_in), dtype=jnp.float32)
    y_big = neural_net1_forward(x_big, w1, b1, w2, b2, tile_b=128)
    jax.block_until_ready(y_big)
    y_big_ref = neural_net1_reference(x_big, w1, b1, w2, b2)
    assert y_big.shape == (300, 1)
    assert jnp.allclose(y_big, y_big_ref, atol=1e-3, rtol=1e-3), \
        float(jnp.max(jnp.abs(y_big - y_big_ref)))

    # Default tile path with a non-128-aligned batch (single ragged block).
    x_mid = jax.random.normal(k_x, (1000, D_in), dtype=jnp.float32)
    y_mid = neural_net1_forward(x_mid, w1, b1, w2, b2)
    jax.block_until_ready(y_mid)
    y_mid_ref = neural_net1_reference(x_mid, w1, b1, w2, b2)
    assert y_mid.shape == (1000, 1)
    assert jnp.allclose(y_mid, y_mid_ref, atol=1e-3, rtol=1e-3), \
        float(jnp.max(jnp.abs(y_mid - y_mid_ref)))

    print("KERNEL_OK")
</pallas_src>

<mosaic_0001>
module attributes {stable_mosaic.version = 11 : i64} {
  func.func @_mlp_kernel(%arg0: i32, %arg1: memref<8x32xf32, #tpu.memory_space<vmem>>, %arg2: memref<64x32xf32, #tpu.memory_space<vmem>>, %arg3: memref<64x1xf32, #tpu.memory_space<vmem>>, %arg4: memref<64x1xf32, #tpu.memory_space<vmem>>, %arg5: memref<1x1xf32, #tpu.memory_space<vmem>>, %arg6: memref<1x8xf32, #tpu.memory_space<vmem>>) attributes {dimension_semantics = [#tpu.dimension_semantics<parallel>], iteration_bounds = array<i64: 1>, scalar_prefetch = 0 : i64, scratch_operands = 0 : i64, tpu.core_type = #tpu.core_type<tc>, window_params = [{transform_indices = @transform_0, window_bounds = array<i64: 8, 32>}, {pipeline_mode = #tpu.pipeline_mode<synchronous>, transform_indices = @transform_1, window_bounds = array<i64: 64, 32>}, {pipeline_mode = #tpu.pipeline_mode<synchronous>, transform_indices = @transform_2, window_bounds = array<i64: 64, 1>}, {pipeline_mode = #tpu.pipeline_mode<synchronous>, transform_indices = @transform_3, window_bounds = array<i64: 64, 1>}, {pipeline_mode = #tpu.pipeline_mode<synchronous>, transform_indices = @transform_4, window_bounds = array<i64: 1, 1>}, {transform_indices = @transform_5, window_bounds = array<i64: 1, 8>}]} {
    %c0 = arith.constant 0 : index
    %c0_0 = arith.constant 0 : index
    %0 = vector.load %arg2[%c0, %c0_0] : memref<64x32xf32, #tpu.memory_space<vmem>>, vector<64x32xf32>
    %c0_1 = arith.constant 0 : index
    %c0_2 = arith.constant 0 : index
    %1 = vector.load %arg1[%c0_1, %c0_2] : memref<8x32xf32, #tpu.memory_space<vmem>>, vector<8x32xf32>
    %cst = arith.constant dense<0.000000e+00> : vector<64x8xf32>
    %2 = tpu.matmul %0, %1, %cst {dimension_numbers = #tpu.dot_dimension_numbers<[1], [1], [0], [0], [0, 0, 1, 0], [], []>} : vector<64x32xf32>, vector<8x32xf32>, vector<64x8xf32> -> vector<64x8xf32>
    %c0_3 = arith.constant 0 : index
    %c0_4 = arith.constant 0 : index
    %3 = vector.load %arg3[%c0_3, %c0_4] : memref<64x1xf32, #tpu.memory_space<vmem>>, vector<64x1xf32>
    %4 = vector.broadcast %3 : vector<64x1xf32> to vector<64x8xf32>
    %5 = arith.addf %2, %4 : vector<64x8xf32>
    %cst_5 = arith.constant 0.000000e+00 : f32
    %6 = vector.broadcast %cst_5 : f32 to vector<64x8xf32>
    %7 = arith.maximumf %5, %6 : vector<64x8xf32>
    %c0_6 = arith.constant 0 : index
    %c0_7 = arith.constant 0 : index
    %8 = vector.load %arg4[%c0_6, %c0_7] : memref<64x1xf32, #tpu.memory_space<vmem>>, vector<64x1xf32>
    %9 = vector.broadcast %8 : vector<64x1xf32> to vector<64x8xf32>
    %10 = arith.mulf %7, %9 : vector<64x8xf32>
    %cst_8 = arith.constant dense<0.000000e+00> : vector<8xf32>
    %11 = vector.multi_reduction <add>, %10, %cst_8 [0] : vector<64x8xf32> to vector<8xf32>
    %12 = vector.shape_cast %11 : vector<8xf32> to vector<1x8xf32>
    %c0_9 = arith.constant 0 : index
    %c0_10 = arith.constant 0 : index
    %13 = vector.load %arg5[%c0_9, %c0_10] : memref<1x1xf32, #tpu.memory_space<vmem>>, vector<1x1xf32>
    %14 = vector.broadcast %13 : vector<1x1xf32> to vector<1x8xf32>
    %15 = arith.addf %12, %14 : vector<1x8xf32>
    %16 = arith.negf %15 : vector<1x8xf32>
    %17 = math.exp %16 : vector<1x8xf32>
    %cst_11 = arith.constant 1.000000e+00 : f32
    %18 = vector.broadcast %cst_11 : f32 to vector<1x8xf32>
    %19 = arith.addf %18, %17 : vector<1x8xf32>
    %20 = arith.divf %18, %19 : vector<1x8xf32>
    %c0_12 = arith.constant 0 : index
    %c0_13 = arith.constant 0 : index
    %21 = vector.load %arg6[%c0_12, %c0_13] : memref<1x8xf32, #tpu.memory_space<vmem>>, vector<1x8xf32>
    tpu.vector_store %arg6[%c0_12, %c0_13], %20 {strides = array<i32>} : memref<1x8xf32, #tpu.memory_space<vmem>>, vector<1x8xf32>,
    return
  }
  func.func @transform_0(%arg0: i32) -> (i32, i32) {
    %c0_i32 = arith.constant 0 : i32
    %c0_i32_0 = arith.constant 0 : i32
    return %arg0, %c0_i32 : i32, i32
  }
  func.func @transform_1(%arg0: i32) -> (i32, i32) {
    %c0_i32 = arith.constant 0 : i32
    %c0_i32_0 = arith.constant 0 : i32
    %c0_i32_1 = arith.constant 0 : i32
    return %c0_i32, %c0_i32_0 : i32, i32
  }
  func.func @transform_2(%arg0: i32) -> (i32, i32) {
    %c0_i32 = arith.constant 0 : i32
    %c0_i32_0 = arith.constant 0 : i32
    %c0_i32_1 = arith.constant 0 : i32
    return %c0_i32, %c0_i32_0 : i32, i32
  }
  func.func @transform_3(%arg0: i32) -> (i32, i32) {
    %c0_i32 = arith.constant 0 : i32
    %c0_i32_0 = arith.constant 0 : i32
    %c0_i32_1 = arith.constant 0 : i32
    return %c0_i32, %c0_i32_0 : i32, i32
  }
  func.func @transform_4(%arg0: i32) -> (i32, i32) {
    %c0_i32 = arith.constant 0 : i32
    %c0_i32_0 = arith.constant 0 : i32
    %c0_i32_1 = arith.constant 0 : i32
    return %c0_i32, %c0_i32_0 : i32, i32
  }
  func.func @transform_5(%arg0: i32) -> (i32, i32) {
    %c0_i32 = arith.constant 0 : i32
    %c0_i32_0 = arith.constant 0 : i32
    return %c0_i32, %arg0 : i32, i32
  }
}

</mosaic_0001>

<bundles_post_ra>
// kernel: tpu_custom_call.1
= control target key start
LH: loop header
LB: loop body
LE: loop exit
PB: predicated region body
PF: predicated region fallthrough
CT: control target
= control target key end

     0   :  { %s541_s0 = inlined_call_operand.vmem [shape: f32[8,32], index: 0, kind: input, shape index: {}]   ;;  %s542_s1 = inlined_call_operand.vmem [shape: f32[64,32], index: 1, kind: input, shape index: {}]   ;;  %s543_s2 = inlined_call_operand.vmem [shape: f32[64,1], index: 2, kind: input, shape index: {}]   ;;  %s544_s3 = inlined_call_operand.vmem [shape: f32[64,1], index: 3, kind: input, shape index: {}]   ;;  %s545_s4 = inlined_call_operand.<no memory space> [shape: f32[1,1], index: 4, kind: input, shape index: {}]   ;;  %s546_s5 = inlined_call_operand.hbm [shape: f32[1,8], index: 5, kind: output, shape index: {}]  }
   0x1   :  { %v10_v0 = vstv %s545_s4 }
   0x2   :  { %11 = vst [vmem:[#allocation2] sm:$0x1] %v10_v0 }
   0x3   :  { %v31_v1 = vld [vmem:[%s541_s0] sm:$0xff]  ;;  %vm80_vm0 = vcmask 261120   ;;  %v24_v4 = vld [vmem:[%s542_s1 + $0x8] sm:$0xff]  ;;  %v25_v6 = vld [vmem:[%s542_s1 + $0x10] sm:$0xff]  ;;  %v399_v8 = vmov 0  }
   0x4   :  { %v23_v2 = vld [vmem:[%s542_s1] sm:$0xff]  ;;  %351 = vmatprep.subr.msk.mxu0 %vm80_vm0, %v31_v1  ;;  %365 = vmatprep.subr.msk.mxu1 %vm80_vm0, %v31_v1  ;;  %v28_v5 = vld [vmem:[%s542_s1 + $0x28] sm:$0xff]  ;;  %v29_v7 = vld [vmem:[%s542_s1 + $0x30] sm:$0xff] }
   0x5   :  { %v27_v3 = vld [vmem:[%s542_s1 + $0x20] sm:$0xff]  ;;  %352 = vmatpush3.xpose.msk.msra.mxu0 %vm80_vm0, %v31_v1  ;;  %366 = vmatpush3.xpose.msk.msra.mxu1 %vm80_vm0, %v31_v1  ;;  %v34_v10 = vld [vmem:[%s543_s2 + $0x10] sm:$0xff]  ;;  %v26_v11 = vld [vmem:[%s542_s1 + $0x18] sm:$0xff] }
   0x6   :  { %353 = vmatprep.mubr.msk.f32.mxu0 %vm80_vm0, %v23_v2  ;;  %359 = vmatprep.mubr.msk.f32.mxu1 %vm80_vm0, %v27_v3  ;;  %v32_v9 = vld [vmem:[%s543_s2] sm:$0xff]  ;;  %v30_v12 = vld [vmem:[%s542_s1 + $0x38] sm:$0xff]  ;;  %v33_v13 = vld [vmem:[%s543_s2 + $0x8] sm:$0xff] }
   0x7   :  { %369 = vset.pattern.permute.xlu0 %v399_v8  ;;  %370 = vset.pattern.permute.xlu1 %v399_v8  ;;  %v35_v14 = vld [vmem:[%s543_s2 + $0x18] sm:$0xff] }
   0x8   :  { %354 = vmatmul.mubr.msk.f32.vlgmr.msra.gmra.mrb[0].mxu0 %vm80_vm0, %v24_v4  ;;  %360 = vmatmul.mubr.msk.f32.vlgmr.msra.gmra.mrb[0].mxu1 %vm80_vm0, %v28_v5 }
   0x9   :  { %356 = vmatprep.mubr.msk.f32.mxu0 %vm80_vm0, %v25_v6  ;;  %362 = vmatprep.mubr.msk.f32.mxu1 %vm80_vm0, %v29_v7 }
   0xa   :  { %42 = vperm.xlu0 %369, %v32_v9   ;;  %52 = vperm.xlu1 %370, %v34_v10  }
   0xb   :  { %12 = vsyncpa [#allocation4], 0  ;;  %v221_v15 = vld [vmem:[%s544_s3] sm:$0xff]  ;;  %v222_v16 = vld [vmem:[%s544_s3 + $0x8] sm:$0xff]  ;;  %vm277_vm1 = vcmask 64512   ;;  %vm316_vm2 = vcmask 57344  }
   0xc   :  { %357 = vmatmul.mubr.msk.f32.gmra.mrb[2].mxu0 %vm80_vm0, %v26_v11  ;;  %363 = vmatmul.mubr.msk.f32.gmra.mrb[2].mxu1 %vm80_vm0, %v30_v12  ;;  %v36_v17 = vld [vmem:[%s543_s2 + $0x20] sm:$0xff]  ;;  %v223_v18 = vld [vmem:[%s544_s3 + $0x10] sm:$0xff]  ;;  %v37_v19 = vld [vmem:[%s543_s2 + $0x28] sm:$0xff] }
   0xd   :  { %v224_v20 = vld [vmem:[%s544_s3 + $0x18] sm:$0xff]  ;;  %v38_v21 = vld [vmem:[%s543_s2 + $0x30] sm:$0xff]  ;;  %v225_v22 = vld [vmem:[%s544_s3 + $0x20] sm:$0xff] }
   0xe   :  { %47 = vperm.xlu0 %369, %v33_v13   ;;  %57 = vperm.xlu1 %370, %v35_v14   ;;  %v39_v23 = vld [vmem:[%s543_s2 + $0x38] sm:$0xff]  ;;  %v226_v24 = vld [vmem:[%s544_s3 + $0x28] sm:$0xff]  ;;  %v227_v25 = vld [vmem:[%s544_s3 + $0x30] sm:$0xff]  ;;  %s400_s2 = smov [#allocation3]  }
   0xf   :  { %v228_v26 = vld [vmem:[%s544_s3 + $0x38] sm:$0xff]  ;;  %v299_v27 = vld [vmem:[#allocation2] sm:$0x1]  ;;  %s324_s3 = sshll.u32 %s400_s2, 4  ;;  %s325_s3 = int_to_ptr.vmem [resolvable:$true] %s324_s3 }
  0x10   :  { %s375_s15 = scalar_lea.vmem %s325_s3, 16  ;;  %s379_s16 = scalar_lea.vmem %s325_s3, 32 }
  0x11   :  { %p376_p0 = scmp.ne.s32.totalorder %s325_s3, %s375_s15  ;;  %p380_p1 = scmp.lt.s32.totalorder %s325_s3, %s325_s3 }
  0x12   :  { %231 = vperm.xlu0 %369, %v221_v15   ;;  %236 = vperm.xlu1 %370, %v222_v16   ;;  %p381_p2 = scmp.lt.s32.totalorder %s379_s16, %s375_s15 }
  0x14   :  { %p382_p3 = por %p381_p2, %p380_p1 }
  0x16   :  { %62 = vperm.xlu0 %369, %v36_v17   ;;  %241 = vperm.xlu1 %370, %v223_v18   ;;  %p383_p4 = pnand %p382_p3, %p376_p0 }
  0x1a   :  { %67 = vperm.xlu0 %369, %v37_v19   ;;  %246 = vperm.xlu1 %370, %v224_v20  }
  0x1e   :  { %72 = vperm.xlu0 %369, %v38_v21   ;;  %251 = vperm.xlu1 %370, %v225_v22  }
  0x22   :  { %77 = vperm.xlu0 %369, %v39_v23   ;;  %256 = vperm.xlu1 %370, %v226_v24  }
  0x26   :  { %261 = vperm.xlu0 %369, %v227_v25   ;;  %266 = vperm.xlu1 %370, %v228_v26   ;;  %v305_v26 = vlaneseq }
  0x2a   :  { %302 = vperm.xlu0 %369, %v299_v27  }
  0x89   :  { %v43_v28 = vpop.permute.xlu0 %42  ;;  %v53_v29 = vpop.permute.xlu1 %52 }
  0x8d   :  { %v48_v30 = vpop.permute.xlu0 %47  ;;  %v58_v31 = vpop.permute.xlu1 %57 }
  0x91   :  { %v232_v32 = vpop.permute.xlu0 %231  ;;  %v237_v33 = vpop.permute.xlu1 %236 }
  0x95   :  { %v63_v34 = vpop.permute.xlu0 %62  ;;  %v242_v35 = vpop.permute.xlu1 %241 }
  0x99   :  { %v68_v36 = vpop.permute.xlu0 %67  ;;  %v247_v37 = vpop.permute.xlu1 %246 }
  0x9d   :  { %v73_v44 = vpop.permute.xlu0 %72  ;;  %v252_v45 = vpop.permute.xlu1 %251 }
  0xa1   :  { %v78_v0 = vpop.permute.xlu0 %77  ;;  %v257_v6 = vpop.permute.xlu1 %256 }
  0xa5   :  { %v262_v14 = vpop.permute.xlu0 %261  ;;  %v267_v18 = vpop.permute.xlu1 %266 }
  0xdb   :  { %v355_v38 = vpop.f32.mrb[0].mxu0  ;;  %v361_v39 = vpop.f32.mrb[0].mxu1 }
  0xdc   :  { %v180_v40 = vadd.f32 %v355_v38, %v48_v30  ;;  %v174_v41 = vpop.f32.mrb[1].mxu0  ;;  %v194_v42 = vpop.f32.mrb[1].mxu1  ;;  %v200_v55 = vadd.f32 %v361_v39, %v68_v36 }
  0xdd   :  { %v175_v43 = vadd.f32 %v174_v41, %v43_v28  ;;  %v195_v48 = vadd.f32 %v194_v42, %v63_v34  ;;  %v303_v34 = vpop.permute.xlu0 %302 }
  0xde   :  { %v214_v46 = vmax.f32 %v180_v40, 0.0  ;;  %v218_v2 = vmax.f32 %v200_v55, 0.0 }
  0xdf   :  { %v213_v47 = vmax.f32 %v175_v43, 0.0  ;;  %v358_v49 = vpop.f32.mrb[2].mxu0  ;;  %v364_v50 = vpop.f32.mrb[2].mxu1  ;;  %v217_v61 = vmax.f32 %v195_v48, 0.0 }
  0xe0   :  { %v270_v51 = vmul.f32 %v237_v33, %v214_v46  ;;  %v190_v52 = vadd.f32 %v358_v49, %v58_v31  ;;  %v184_v53 = vpop.f32.mrb[3].mxu0  ;;  %v204_v54 = vpop.f32.mrb[3].mxu1  ;;  %v210_v4 = vadd.f32 %v364_v50, %v78_v0  ;;  %v274_v11 = vmul.f32 %v257_v6, %v218_v2 }
  0xe1   :  { %v269_v56 = vmul.f32 %v232_v32, %v213_v47  ;;  %v185_v57 = vadd.f32 %v184_v53, %v53_v29  ;;  %v205_v63 = vadd.f32 %v204_v54, %v73_v44  ;;  %v273_v7 = vmul.f32 %v252_v45, %v217_v61 }
  0xe2   :  { %v279_v58 = vsel %vm277_vm1, %v270_v51, 0.0  ;;  %v216_v59 = vmax.f32 %v190_v52, 0.0  ;;  %v220_v13 = vmax.f32 %v210_v4, 0.0  ;;  %v287_v20 = vsel %vm277_vm1, %v274_v11, 0.0 }
  0xe3   :  { %v278_v60 = vsel %vm277_vm1, %v269_v56, 0.0  ;;  %v215_v62 = vmax.f32 %v185_v57, 0.0  ;;  %v219_v9 = vmax.f32 %v205_v63, 0.0  ;;  %v285_v16 = vsel %vm277_vm1, %v273_v7, 0.0 }
  0xe4   :  { %v280_v1 = vadd.f32 %v279_v58, %v278_v60  ;;  %v272_v3 = vmul.f32 %v247_v37, %v216_v59  ;;  %v276_v21 = vmul.f32 %v267_v18, %v220_v13  ;;  %v306_v29 = vshrl.u32 %v305_v26, 7 }
  0xe5   :  { %v271_v5 = vmul.f32 %v242_v35, %v215_v62  ;;  %v275_v17 = vmul.f32 %v262_v14, %v219_v9 }
  0xe6   :  { %v283_v12 = vsel %vm277_vm1, %v272_v3, 0.0  ;;  %v291_v25 = vsel %vm277_vm1, %v276_v21, 0.0  ;;  %v307_v32 = vsub.s32 0, %v306_v29 }
  0xe7   :  { %v281_v8 = vsel %vm277_vm1, %v271_v5, 0.0  ;;  %v289_v23 = vsel %vm277_vm1, %v275_v17, 0.0 }
  0xe8   :  { %v282_v10 = vadd.f32 %v281_v8, %v280_v1  ;;  %v308_v36 = vrot.slane %v303_v34, %v307_v32 }
  0xea   :  { %v284_v15 = vadd.f32 %v283_v12, %v282_v10 }
  0xec   :  { %v286_v19 = vadd.f32 %v285_v16, %v284_v15 }
  0xee   :  { %v288_v22 = vadd.f32 %v287_v20, %v286_v19 }
  0xf0   :  { %v290_v24 = vadd.f32 %v289_v23, %v288_v22 }
  0xf2   :  { %v292_v27 = vadd.f32 %v291_v25, %v290_v24 }
  0xf4   :  { %v293_v28 = vrot.slane %v292_v27, 4 }
  0xf6   :  { %v294_v30 = vadd.f32 %v293_v28, %v292_v27 }
  0xf8   :  { %v295_v31 = vrot.slane %v294_v30, 2 }
  0xfa   :  { %v296_v33 = vadd.f32 %v295_v31, %v294_v30 }
  0xfc   :  { %v297_v35 = vrot.slane %v296_v33, 1 }
  0xfe   :  { %v298_v37 = vadd.f32 %v297_v35, %v296_v33 }
 0x100   :  { %v309_v38 = vadd.f32 %v308_v36, %v298_v37 }
 0x102   :  { %v341_v39 = vmul.f32 -1.442695, %v309_v38 }
 0x104   :  { %371 = vpow2.f32 %v341_v39 }
 0x10e   :  { %v372_v40 = vpop.eup %371 }
 0x10f   :  { %v313_v41 = vadd.f32 1.0, %v372_v40 }
 0x111   :  { %373 = vrcp.f32 %v313_v41 }
 0x11b   :  { %v374_v42 = vpop.eup %373 }
 0x11c   :  { %317 = vst.msk [vmem:[#allocation3] sm:$0x1] %vm316_vm2, %v374_v42 }
 0x11d   :  { %386 = shalt.err (!%p383_p4)
}
 0x11e   :  { %s387_s19 = scalar_lea.hbm %s546_s5, 16 }
 0x11f   :  { %p388_p5 = scmp.ne.s32.totalorder %s546_s5, %s387_s19  ;;  %p391_p6 = scmp.lt.u32.totalorder %s387_s19, %s546_s5 }
 0x121   :  { %p393_p7 = pnand %p391_p6, %p388_p5 }
 0x123   :  { %396 = shalt.err (!%p393_p7)
}
 0x124   :  { %327 = dma.vmem_to_hbm [thread:$0]  %s325_s3, 16, %s546_s5, [#allocation4]  }
 0x125   :  { %397 = dma.done.wait [#allocation4], 16  }
 0x126   :  { %398 = vsyncadd [#allocation4], 4294967280 }
 0x127   :  { %331 = vsyncpa [#allocation4], 1 }

</bundles_post_ra>
